<compile_context>
chip_gen: v7x
topology: tpu7x:2x2x1
jax: 0.10.0
libtpu: 0.0.40
codegen_flags: <defaults>
</compile_context>

<pallas_src>
import math

import jax
import jax.numpy as jnp
from jax import lax
from jax.experimental import pallas as pl
from jax.experimental.pallas import tpu as pltpu


def _cdiv(a, b):
    return (a + b - 1) // b


def _round_up(a, b):
    return _cdiv(a, b) * b


def _is_v7x():
    try:
        kind = jax.devices()[0].device_kind.lower()
    except Exception:
        kind = ""
    return "v7" in kind


def _target_block_bytes():
    # ~1 MiB blocks amortize the ~0.35us/grid-step overhead on v5e/v6e (>=85%
    # of HBM roofline).  On v7x a 1 MiB step is only ~1.2us at 3.2 TB/s, so use
    # ~2 MiB there to keep per-step overhead <15%.
    return (2 << 20) if _is_v7x() else (1 << 20)


def _vmem_limit_bytes():
    # Explicit scoped-VMEM limit (v5e default is only 16 MiB).  Budget covers
    # double-buffered in/out blocks plus the in-kernel f32/bf16 temporaries.
    return (48 << 20) if _is_v7x() else (32 << 20)


def _pack_factor(C):
    """Rows packed per lane-dense slab; L = pack * C is a multiple of 128."""
    if C % 128 == 0:
        return 1                      # already lane-dense
    L = math.lcm(C, 128)
    if L <= 512:                      # keep the slab / seg matmul small
        return L // C
    # TODO(synk): for large C with C % 128 != 0, lane-pad the last 128-lane
    # group in-kernel instead of accepting masked stores on the tail group.
    return 1


# ---------------------------------------------------------------------------
# channels_last kernels
# ---------------------------------------------------------------------------

def _make_packed_kernel(C, pack, eps, in_dtype):
    """pack > 1: `pack` rows side-by-side in each 128-lane slab; per-segment
    mean / E[x^2] come from one bf16 MXU matmul against the resident 0/1
    block-diagonal `seg` matrix (bf16 hi/lo split keeps ~f32 accuracy)."""
    inv_c = 1.0 / C
    skip_lo = jnp.dtype(in_dtype) == jnp.dtype(jnp.bfloat16)

    def kernel(x_ref, g_ref, b_ref, seg_ref, o_ref):
        x = x_ref[...].astype(jnp.float32)            # (T, L), lane-dense
        seg = seg_ref[...]                            # (L, L) bf16, resident
        T = x.shape[0]

        xsq = x * x
        parts = [x.astype(jnp.bfloat16)]
        if not skip_lo:                               # x_lo == 0 for bf16 input
            parts.append((x - parts[0].astype(jnp.float32)).astype(jnp.bfloat16))
        nx = len(parts)
        xsq_hi = xsq.astype(jnp.bfloat16)
        parts.append(xsq_hi)
        parts.append((xsq - xsq_hi.astype(jnp.float32)).astype(jnp.bfloat16))

        # Single MXU pass: per-segment sums of x and x^2, broadcast back across
        # each C-lane segment.  Loads/stores/VPU stay 128-lane dense.
        res = jnp.dot(jnp.concatenate(parts, axis=0), seg,
                      preferred_element_type=jnp.float32)   # (len(parts)*T, L)

        sum_x = res[0:T]
        if nx == 2:
            sum_x = sum_x + res[T:2 * T]
        sum_xsq = res[nx * T:(nx + 1) * T] + res[(nx + 1) * T:(nx + 2) * T]

        mean = sum_x * inv_c
        var = jnp.maximum(sum_xsq * inv_c - mean * mean, 0.0)   # biased var, f32
        inv = lax.rsqrt(var + eps)
        g = g_ref[...].astype(jnp.float32)            # (1, L)
        b = b_ref[...].astype(jnp.float32)
        o_ref[...] = ((x - mean) * inv * g + b).astype(o_ref.dtype)

    return kernel


def _make_rowwise_kernel(eps):
    """pack == 1: plain row-wise LayerNorm over the lane axis."""
    def kernel(x_ref, g_ref, b_ref, o_ref):
        x = x_ref[...].astype(jnp.float32)
        mean = jnp.mean(x, axis=-1, keepdims=True)
        xc = x - mean
        var = jnp.mean(xc * xc, axis=-1, keepdims=True)
        inv = lax.rsqrt(var + eps)
        g = g_ref[...].astype(jnp.float32)
        b = b_ref[...].astype(jnp.float32)
        o_ref[...] = (xc * inv * g + b).astype(o_ref.dtype)
    return kernel


def _layer_norm_channels_last_2d(x2, weight, bias, eps):
    """x2: (N, C); LayerNorm each row over its C channels."""
    N, C = x2.shape
    out_dtype = x2.dtype
    itemsize = jnp.dtype(x2.dtype).itemsize

    pack = _pack_factor(C)
    L = pack * C

    # Pad rows only up to a multiple of `pack` (at most pack-1 rows); partial
    # last TILES are handled by the cdiv grid, not by padding.
    n_pad_rows = (-N) % pack
    if n_pad_rows:
        x2 = jnp.pad(x2, ((0, n_pad_rows), (0, 0)))
    n_rows = (N + n_pad_rows) // pack
    xp = x2.reshape(n_rows, L)

    target = _target_block_bytes()
    tile_rows = max(8, (target // (L * itemsize)) // 8 * 8)
    if n_rows <= 8:
        tile_rows = n_rows                       # full (possibly <8) sublane dim
    else:
        tile_rows = min(tile_rows, (n_rows // 8) * 8)
        if n_rows >= 16:
            # v7x: keep >= 2 grid steps so both TensorCores get work.
            tile_rows = min(tile_rows, _round_up(_cdiv(n_rows, 2), 8))
    grid = (_cdiv(n_rows, tile_rows),)

    gamma = jnp.tile(weight.reshape(1, C), (1, pack)).astype(jnp.float32)
    beta = jnp.tile(bias.reshape(1, C), (1, pack)).astype(jnp.float32)

    in_specs = [
        pl.BlockSpec((tile_rows, L), lambda i: (i, 0)),
        pl.BlockSpec((1, L), lambda i: (0, 0)),          # resident
        pl.BlockSpec((1, L), lambda i: (0, 0)),          # resident
    ]
    args = [xp, gamma, beta]
    if pack > 1:
        # Hoisted 0/1 block-diagonal segment matrix, DMA'd once and resident.
        seg_ids = jnp.arange(L, dtype=jnp.int32) // C
        seg = (seg_ids[:, None] == seg_ids[None, :]).astype(jnp.bfloat16)
        in_specs.append(pl.BlockSpec((L, L), lambda i: (0, 0)))
        args.append(seg)
        kernel = _make_packed_kernel(C, pack, eps, x2.dtype)
    else:
        kernel = _make_rowwise_kernel(eps)

    out = pl.pallas_call(
        kernel,
        out_shape=jax.ShapeDtypeStruct((n_rows, L), out_dtype),
        grid_spec=pltpu.PrefetchScalarGridSpec(
            num_scalar_prefetch=0,
            grid=grid,
            in_specs=in_specs,
            out_specs=pl.BlockSpec((tile_rows, L), lambda i: (i, 0)),
        ),
        compiler_params=pltpu.CompilerParams(
            dimension_semantics=("parallel",),
            vmem_limit_bytes=_vmem_limit_bytes(),
        ),
    )(*args)

    out = out.reshape(n_rows * pack, C)
    if n_pad_rows:
        out = out[:N]
    return out


# ---------------------------------------------------------------------------
# channels_first kernel
# ---------------------------------------------------------------------------

def _make_channels_first_kernel(eps):
    def kernel(x_ref, g_ref, b_ref, o_ref):
        x = x_ref[...].astype(jnp.float32)            # (C, Ts): lanes = spatial
        mean = jnp.mean(x, axis=0, keepdims=True)     # reduce over channels
        xc = x - mean
        var = jnp.mean(xc * xc, axis=0, keepdims=True)
        inv = lax.rsqrt(var + eps)
        g = g_ref[...].astype(jnp.float32)            # (C, 1)
        b = b_ref[...].astype(jnp.float32)
        o_ref[...] = (xc * inv * g + b).astype(o_ref.dtype)
        # TODO(synk): for C >= 512, offload the channel reduction to the MXU
        # (ones(1,C) @ [x; x*x]) if profiling shows VALU/vld, not HBM, binding.
    return kernel


def _layer_norm_channels_first(x, weight, bias, eps):
    """x: (B, C, *spatial); normalize over axis 1."""
    B, C = x.shape[0], x.shape[1]
    S = int(math.prod(x.shape[2:]))
    itemsize = jnp.dtype(x.dtype).itemsize
    x3 = x.reshape(B, C, S)                           # free reshape; lanes = spatial

    target = _target_block_bytes()
    if S <= 128:
        tile_s = S                                    # full (possibly masked) lane dim
    else:
        tile_s = max(128, (target // (C * itemsize)) // 128 * 128)
        tile_s = min(tile_s, (S // 128) * 128)
        if B * _cdiv(S, tile_s) < 2:
            # v7x: keep >= 2 grid steps so both TensorCores get work.
            tile_s = max(128, min(tile_s, _round_up(_cdiv(S, 2), 128)))
    grid = (B, _cdiv(S, tile_s))                      # partial edge tile, no pad

    gamma = weight.reshape(C, 1).astype(jnp.float32)
    beta = bias.reshape(C, 1).astype(jnp.float32)

    out = pl.pallas_call(
        _make_channels_first_kernel(eps),
        out_shape=jax.ShapeDtypeStruct((B, C, S), x.dtype),
        grid_spec=pltpu.PrefetchScalarGridSpec(
            num_scalar_prefetch=0,
            grid=grid,
            in_specs=[
                pl.BlockSpec((None, C, tile_s), lambda bi, si: (bi, 0, si)),
                pl.BlockSpec((C, 1), lambda bi, si: (0, 0)),
                pl.BlockSpec((C, 1), lambda bi, si: (0, 0)),
            ],
            out_specs=pl.BlockSpec((None, C, tile_s), lambda bi, si: (bi, 0, si)),
        ),
        compiler_params=pltpu.CompilerParams(
            dimension_semantics=("parallel", "parallel"),
            vmem_limit_bytes=_vmem_limit_bytes(),
        ),
    )(x3, gamma, beta)

    return out.reshape(x.shape)


# ---------------------------------------------------------------------------
# Public entry point + reference
# ---------------------------------------------------------------------------

def layer_norm(x, weight, bias, *, eps=1e-6, data_format="channels_last"):
    """Forward pass equivalent of the PyTorch LayerNorm module."""
    if data_format not in ("channels_last", "channels_first"):
        raise NotImplementedError(data_format)
    if data_format == "channels_last":
        C = x.shape[-1]
        N = int(math.prod(x.shape[:-1]))
        y2 = _layer_norm_channels_last_2d(x.reshape(N, C), weight, bias, eps)
        return y2.reshape(x.shape)
    return _layer_norm_channels_first(x, weight, bias, eps)


def _reference(x, weight, bias, eps, data_format):
    x32 = x.astype(jnp.float32)
    if data_format == "channels_last":
        mean = jnp.mean(x32, axis=-1, keepdims=True)
        var = jnp.mean((x32 - mean) ** 2, axis=-1, keepdims=True)
        y = (x32 - mean) / jnp.sqrt(var + eps)
        return (y * weight + bias).astype(x.dtype)
    mean = jnp.mean(x32, axis=1, keepdims=True)
    var = jnp.mean((x32 - mean) ** 2, axis=1, keepdims=True)
    y = (x32 - mean) / jnp.sqrt(var + eps)
    shape = (1, -1) + (1,) * (x.ndim - 2)
    return (weight.reshape(shape) * y + bias.reshape(shape)).astype(x.dtype)


if __name__ == "__main__":
    key = jax.random.PRNGKey(0)
    k1, k2, k3, k4 = jax.random.split(key, 4)

    C = 32
    # PyTorch init is weight=1, bias=0; perturb so the affine part is exercised.
    weight = jnp.ones((C,), jnp.float32) + 0.01 * jnp.arange(C, dtype=jnp.float32)
    bias = 0.02 * jnp.arange(C, dtype=jnp.float32)

    # channels_last: (B, H, W, C), aligned
    x_last = jax.random.normal(k1, (2, 16, 16, C), dtype=jnp.float32)
    y_last = jax.block_until_ready(
        layer_norm(x_last, weight, bias, data_format="channels_last"))
    ref_last = _reference(x_last, weight, bias, 1e-6, "channels_last")
    assert y_last.shape == x_last.shape
    assert jnp.allclose(y_last, ref_last, atol=1e-4, rtol=1e-4), "channels_last mismatch"

    # channels_last, non-aligned row count (exercises partial edge tile, no big pad)
    x_odd = jax.random.normal(k2, (2, 5, 7, C), dtype=jnp.float32)
    y_odd = jax.block_until_ready(
        layer_norm(x_odd, weight, bias, data_format="channels_last"))
    ref_odd = _reference(x_odd, weight, bias, 1e-6, "channels_last")
    assert jnp.allclose(y_odd, ref_odd, atol=1e-4, rtol=1e-4), "channels_last (odd N) mismatch"

    # channels_last, bf16 input (dtype-aware tiling, skipped x_lo term)
    x_bf = jax.random.normal(k3, (2, 16, 16, C), dtype=jnp.float32).astype(jnp.bfloat16)
    y_bf = jax.block_until_ready(
        layer_norm(x_bf, weight, bias, data_format="channels_last"))
    ref_bf = _reference(x_bf, weight, bias, 1e-6, "channels_last")
    assert jnp.allclose(y_bf.astype(jnp.float32), ref_bf.astype(jnp.float32),
                        atol=5e-2, rtol=5e-2), "channels_last (bf16) mismatch"

    # channels_first: (B, C, H, W)
    x_first = jax.random.normal(k4, (2, C, 16, 16), dtype=jnp.float32)
    y_first = jax.block_until_ready(
        layer_norm(x_first, weight, bias, data_format="channels_first"))
    ref_first = _reference(x_first, weight, bias, 1e-6, "channels_first")
    assert y_first.shape == x_first.shape
    assert jnp.allclose(y_first, ref_first, atol=3e-5, rtol=3e-5), "channels_first mismatch"

    print("KERNEL_OK")
</pallas_src>

<mosaic_0001>
module attributes {stable_mosaic.version = 11 : i64} {
  func.func @kernel(%arg0: i32, %arg1: memref<64x128xf32, #tpu.memory_space<vmem>>, %arg2: memref<1x128xf32, #tpu.memory_space<vmem>>, %arg3: memref<1x128xf32, #tpu.memory_space<vmem>>, %arg4: memref<128x128xbf16, #tpu.memory_space<vmem>>, %arg5: memref<64x128xf32, #tpu.memory_space<vmem>>) attributes {dimension_semantics = [#tpu.dimension_semantics<parallel>], iteration_bounds = array<i64: 2>, scalar_prefetch = 0 : i64, scratch_operands = 0 : i64, tpu.core_type = #tpu.core_type<tc>, window_params = [{transform_indices = @transform_0, window_bounds = array<i64: 64, 128>}, {pipeline_mode = #tpu.pipeline_mode<synchronous>, transform_indices = @transform_1, window_bounds = array<i64: 1, 128>}, {pipeline_mode = #tpu.pipeline_mode<synchronous>, transform_indices = @transform_2, window_bounds = array<i64: 1, 128>}, {pipeline_mode = #tpu.pipeline_mode<synchronous>, transform_indices = @transform_3, window_bounds = array<i64: 128, 128>}, {transform_indices = @transform_4, window_bounds = array<i64: 64, 128>}]} {
    %c0 = arith.constant 0 : index
    %c0_0 = arith.constant 0 : index
    %0 = vector.load %arg1[%c0, %c0_0] : memref<64x128xf32, #tpu.memory_space<vmem>>, vector<64x128xf32>
    %c0_1 = arith.constant 0 : index
    %c0_2 = arith.constant 0 : index
    %1 = vector.load %arg4[%c0_1, %c0_2] : memref<128x128xbf16, #tpu.memory_space<vmem>>, vector<128x128xbf16>
    %2 = arith.mulf %0, %0 : vector<64x128xf32>
    %3 = arith.truncf %0 : vector<64x128xf32> to vector<64x128xbf16>
    %4 = arith.extf %3 : vector<64x128xbf16> to vector<64x128xf32>
    %5 = arith.subf %0, %4 : vector<64x128xf32>
    %6 = arith.truncf %5 : vector<64x128xf32> to vector<64x128xbf16>
    %7 = arith.truncf %2 : vector<64x128xf32> to vector<64x128xbf16>
    %8 = arith.extf %7 : vector<64x128xbf16> to vector<64x128xf32>
    %9 = arith.subf %2, %8 : vector<64x128xf32>
    %10 = arith.truncf %9 : vector<64x128xf32> to vector<64x128xbf16>
    %11 = tpu.concatenate %3, %6, %7, %10 in 0 : vector<64x128xbf16>, vector<64x128xbf16>, vector<64x128xbf16>, vector<64x128xbf16> -> vector<256x128xbf16>
    %cst = arith.constant dense<0.000000e+00> : vector<256x128xf32>
    %12 = tpu.matmul %11, %1, %cst {dimension_numbers = #tpu.dot_dimension_numbers<[1], [0], [0], [1], [0, 0, 1, 1], [], []>} : vector<256x128xbf16>, vector<128x128xbf16>, vector<256x128xf32> -> vector<256x128xf32>
    %13 = vector.extract_strided_slice %12 {offsets = [0, 0], sizes = [64, 128], strides = [1, 1]} : vector<256x128xf32> to vector<64x128xf32>
    %14 = vector.extract_strided_slice %12 {offsets = [64, 0], sizes = [64, 128], strides = [1, 1]} : vector<256x128xf32> to vector<64x128xf32>
    %15 = arith.addf %13, %14 : vector<64x128xf32>
    %16 = vector.extract_strided_slice %12 {offsets = [128, 0], sizes = [64, 128], strides = [1, 1]} : vector<256x128xf32> to vector<64x128xf32>
    %17 = vector.extract_strided_slice %12 {offsets = [192, 0], sizes = [64, 128], strides = [1, 1]} : vector<256x128xf32> to vector<64x128xf32>
    %18 = arith.addf %16, %17 : vector<64x128xf32>
    %cst_3 = arith.constant 3.125000e-02 : f32
    %19 = vector.broadcast %cst_3 : f32 to vector<64x128xf32>
    %20 = arith.mulf %15, %19 : vector<64x128xf32>
    %cst_4 = arith.constant 3.125000e-02 : f32
    %21 = vector.broadcast %cst_4 : f32 to vector<64x128xf32>
    %22 = arith.mulf %18, %21 : vector<64x128xf32>
    %23 = arith.mulf %20, %20 : vector<64x128xf32>
    %24 = arith.subf %22, %23 : vector<64x128xf32>
    %cst_5 = arith.constant 0.000000e+00 : f32
    %25 = vector.broadcast %cst_5 : f32 to vector<64x128xf32>
    %26 = arith.maximumf %24, %25 : vector<64x128xf32>
    %cst_6 = arith.constant 9.99999997E-7 : f32
    %27 = vector.broadcast %cst_6 : f32 to vector<64x128xf32>
    %28 = arith.addf %26, %27 : vector<64x128xf32>
    %29 = math.rsqrt %28 : vector<64x128xf32>
    %c0_7 = arith.constant 0 : index
    %c0_8 = arith.constant 0 : index
    %30 = vector.load %arg2[%c0_7, %c0_8] : memref<1x128xf32, #tpu.memory_space<vmem>>, vector<1x128xf32>
    %c0_9 = arith.constant 0 : index
    %c0_10 = arith.constant 0 : index
    %31 = vector.load %arg3[%c0_9, %c0_10] : memref<1x128xf32, #tpu.memory_space<vmem>>, vector<1x128xf32>
    %32 = arith.subf %0, %20 : vector<64x128xf32>
    %33 = arith.mulf %32, %29 : vector<64x128xf32>
    %34 = vector.broadcast %30 : vector<1x128xf32> to vector<64x128xf32>
    %35 = arith.mulf %33, %34 : vector<64x128xf32>
    %36 = vector.broadcast %31 : vector<1x128xf32> to vector<64x128xf32>
    %37 = arith.addf %35, %36 : vector<64x128xf32>
    %c0_11 = arith.constant 0 : index
    %c0_12 = arith.constant 0 : index
    %38 = vector.load %arg5[%c0_11, %c0_12] : memref<64x128xf32, #tpu.memory_space<vmem>>, vector<64x128xf32>
    tpu.vector_store %arg5[%c0_11, %c0_12], %37 {strides = array<i32>} : memref<64x128xf32, #tpu.memory_space<vmem>>, vector<64x128xf32>,
    return
  }
  func.func @transform_0(%arg0: i32) -> (i32, i32) {
    %c0_i32 = arith.constant 0 : i32
    %c0_i32_0 = arith.constant 0 : i32
    return %arg0, %c0_i32 : i32, i32
  }
  func.func @transform_1(%arg0: i32) -> (i32, i32) {
    %c0_i32 = arith.constant 0 : i32
    %c0_i32_0 = arith.constant 0 : i32
    %c0_i32_1 = arith.constant 0 : i32
    return %c0_i32, %c0_i32_0 : i32, i32
  }
  func.func @transform_2(%arg0: i32) -> (i32, i32) {
    %c0_i32 = arith.constant 0 : i32
    %c0_i32_0 = arith.constant 0 : i32
    %c0_i32_1 = arith.constant 0 : i32
    return %c0_i32, %c0_i32_0 : i32, i32
  }
  func.func @transform_3(%arg0: i32) -> (i32, i32) {
    %c0_i32 = arith.constant 0 : i32
    %c0_i32_0 = arith.constant 0 : i32
    %c0_i32_1 = arith.constant 0 : i32
    return %c0_i32, %c0_i32_0 : i32, i32
  }
  func.func @transform_4(%arg0: i32) -> (i32, i32) {
    %c0_i32 = arith.constant 0 : i32
    %c0_i32_0 = arith.constant 0 : i32
    return %arg0, %c0_i32 : i32, i32
  }
}

</mosaic_0001>

<bundles_post_ra>
// kernel: tpu_custom_call.1
= control target key start
LH: loop header
LB: loop body
LE: loop exit
PB: predicated region body
PF: predicated region fallthrough
CT: control target
= control target key end

     0   :  { %9 = vsyncpa [#allocation3], 0  ;;  %s1452_s0 = inlined_call_operand.hbm [shape: f32[128,128], index: 0, kind: input, shape index: {}]   ;;  %s1453_s1 = inlined_call_operand.vmem [shape: f32[1,128], index: 1, kind: input, shape index: {}]   ;;  %s1454_s2 = inlined_call_operand.vmem [shape: f32[1,128], index: 2, kind: input, shape index: {}]   ;;  %s1455_s3 = inlined_call_operand.hbm [shape: bf16[128,128], index: 3, kind: input, shape index: {}]   ;;  %s1456_s4 = inlined_call_operand.hbm [shape: f32[128,128], index: 4, kind: output, shape index: {}]  }
   0x1   :  { %11 = vsyncpa [#allocation3 + $0x1], 0 }
   0x2   :  { %12 = vsyncpa [#allocation6], 0 }
   0x3   :  { %13 = vsyncpa [#allocation4], 0 }
   0x4   :  { %15 = vsyncpa [#allocation4 + $0x1], 0  ;;  %s1129_s15 = smov 0   ;;  %s1131_s16 = smov 0  }
   0x5   :  { %s1133_s17 = smov 0   ;;  %s1135_s18 = smov 0  }
   0x6 LB: > { %s1150_s19 = sadd.s32 4294967295, %s1093_s18   ;;  %s746_s20 = sadd.s32 4294967294, %s1093_s18   ;;  %s1093_s18 = sphi %s1135_s18, %s1476_s18   ;;  %s1089_s17 = sphi %s1133_s17, %s1475_s17   ;;  %s1085_s16 = sphi %s1131_s16, %s1474_s16   ;;  %s1081_s15 = sphi %s1129_s15, %s1473_s15  }
   0x7   : > { %p41_p0 = scmp.ne.s32.totalorder %s1085_s16, %s1081_s15  ;;  %p1457_p1 = scmp.eq.s32.totalorder %s1150_s19, 0 }
   0x8   : > { %p134_p3 = scmp.eq.s32.totalorder %s746_s20, 1  ;;  %p747_p5 = scmp.ge.s32.totalorder %s1093_s18, 1 }
   0x9   : > { %p1159_p4 = por %p1457_p1, %p41_p0  ;;  %p141_p7 = scmp.lt.s32.totalorder %s1093_s18, 3 }
   0xa   : > { %p1164_p6 = por %p134_p3, %p41_p0  ;;  %s1095_s24 = smov [#allocation5]  }
   0xb   : > { %s1460_s21 = scalar_select %p1159_p4, 1, 0 }
   0xc   : > { %s1461_s22 = scalar_select %p1164_p6, 1, 0 }
   0xd   : > { %p1169_p8 = pnand %p747_p5, %p141_p7  ;;  %s159_s25 = sshll.u32 %s1095_s24, 4  ;;  %s1173_s25 = int_to_ptr.vmem [resolvable:$true] %s159_s25 }
   0xe   : > { %s1185_s27 = sadd.s32 1, %s1093_s18   ;;  %s28_s28 = sadd.s32 1, %s1089_s17 }
   0xf   : > { %s1462_s23 = scalar_select %p1169_p8, 1, 0 }
  0x10   : > { %p886_p9 = pneg %p1169_p8  ;;  %s25_s29 = ssub.s32 %s1093_s18, %s1185_s27 }
  0x11   : > { %s965_s6 = scalar_lea.hbm %s1455_s3, 1024 }
  0x12   : > { %p1180_p11 = pnand %p886_p9, %p1457_p1  ;;  %p966_p12 = scmp.ne.s32.totalorder %s1455_s3, %s965_s6 }
  0x13   : > { %p972_p5 = scmp.lt.u32.totalorder %s965_s6, %s1455_s3 }
  0x14   : > { %p967_p13 = pneg %p1180_p11 }
  0x16   : > { %p968_p0 = pnand %p967_p13, %p966_p12 }
  0x18   : > { %p969_p3 = pneg %p968_p0 }
  0x1a   : > { %p974_p7 = pnand %p972_p5, %p969_p3 }
  0x1c   : > { %977 = shalt.err (!%p974_p7)
}
  0x1d   : > { %s978_s11 = scalar_lea.vmem %s1173_s25, 1024  ;;  %p986_p2 = scmp.lt.s32.totalorder %s1173_s25, %s1173_s25 }
  0x1e   : > { %p979_p9 = scmp.ne.s32.totalorder %s1173_s25, %s978_s11  ;;  %p987_p6 = scmp.lt.s32.totalorder %s978_s11, %s978_s11 }
  0x20   : > { %p981_p10 = pnand %p979_p9, %p967_p13  ;;  %p988_p4 = por %p987_p6, %p986_p2 }
  0x22   : > { %p982_p1 = pneg %p981_p10 }
  0x24   : > { %p989_p8 = pnand %p988_p4, %p982_p1 }
  0x26   : > { %992 = shalt.err (!%p989_p8)
}
  0x27   : > { %s1096_s12 = smov 64   ;;  %s1097_s13 = smov 4  }
  0x28   : > { %889 = dma.hbm_to_vmem [thread:$0]  (!%p1180_p11), %s1455_s3, 1024, %s1173_s25, [#allocation6], %s1096_s12, %s1096_s12, %s1097_s13  }
  0x29   : > { %p26_p2 = scmp.eq.s32.totalorder %s25_s29, 0  ;;  %p35_p1 = scmp.ne.s32.totalorder %s1089_s17, %s1085_s16 }
  0x2a   : > { %p36_p4 = scmp.eq.s32.totalorder %s1093_s18, 0  ;;  %p899_p6 = scmp.lt.s32.totalorder %s1093_s18, 2 }
  0x2b   : > { %s1216_s24 = scalar_select %p26_p2, %s1089_s17, %s28_s28  }
  0x2c   : > { %p37_p8 = por %p36_p4, %p35_p1  ;;  %p1464_p10 = scmp.eq.s32.totalorder %s1150_s19, 1 }
  0x2d   : > { %s173_s5 = sand.u32 1, %s1089_s17   ;;  %s772_s6 = sshll.u32 %s1093_s18, 10 }
  0x2e   : > { %p1220_p12 = por %p1464_p10, %p35_p1  ;;  %s750_s7 = sshll.u32 %s173_s5, 6 }
  0x2f   : > { %s1229_s9 = scalar_lea.hbm %s1452_s0, %s772_s6  ;;  %s177_s25 = scalar_lea.vmem [#allocation2], %s750_s7 }
  0x30   : > { %s184_s28 = sshll.u32 %s177_s25, 4  ;;  %p1231_p11 = pnand %p899_p6, %p37_p8  ;;  %s1235_s28 = int_to_ptr.vmem [resolvable:$true] %s184_s28 }
  0x31   : > { %s1237_s10 = scalar_lea.sflag [#allocation3], %s173_s5  ;;  %s993_s11 = scalar_lea.hbm %s1229_s9, 1024 }
  0x32   : > { %p994_p13 = scmp.ne.s32.totalorder %s1229_s9, %s993_s11  ;;  %p995_p0 = pneg %p1231_p11 }
  0x33   : > { %s998_s14 = scalar_lea.hbm %s1452_s0, 2048  ;;  %p999_p7 = scmp.lt.u32.totalorder %s1229_s9, %s1452_s0 }
  0x34   : > { %p996_p3 = pnand %p995_p0, %p994_p13  ;;  %p1000_p9 = scmp.lt.u32.totalorder %s998_s14, %s993_s11 }
  0x35   : > { %p1002_p1 = scmp.lt.u32.totalorder %s993_s11, %s1229_s9 }
  0x36   : > { %p997_p5 = pneg %p996_p3  ;;  %p1001_p2 = por %p1000_p9, %p999_p7 }
  0x38   : > { %p1003_p4 = por %p1002_p1, %p1001_p2 }
  0x3a   : > { %p1004_p6 = pnand %p1003_p4, %p997_p5 }
  0x3c   : > { %1007 = shalt.err (!%p1004_p6)
}
  0x3d   : > { %s1008_s5 = scalar_lea.vmem %s1235_s28, 1024  ;;  %s1098_s7 = smov [#allocation2]  }
  0x3e   : > { %p1009_p8 = scmp.ne.s32.totalorder %s1235_s28, %s1008_s5  ;;  %s1013_s26 = sshll.u32 %s1098_s7, 4  ;;  %s1014_s26 = int_to_ptr.vmem [resolvable:$false] %s1013_s26 }
  0x3f   : > { %s1015_s8 = scalar_lea.vmem %s1014_s26, 2048  ;;  %p1016_p3 = scmp.lt.s32.totalorder %s1235_s28, %s1014_s26 }
  0x40   : > { %p1011_p10 = pnand %p1009_p8, %p995_p0  ;;  %p1017_p7 = scmp.lt.s32.totalorder %s1015_s8, %s1008_s5 }
  0x42   : > { %p1012_p13 = pneg %p1011_p10  ;;  %p1018_p9 = por %p1017_p7, %p1016_p3 }
  0x44   : > { %p1019_p2 = pnand %p1018_p9, %p1012_p13 }
  0x46   : > { %1022 = shalt.err (!%p1019_p2)
}
  0x47   : > { %s1099_s25 = smov 128   ;;  %s1100_s11 = smov 8  }
  0x48   : > { %893 = dma.hbm_to_vmem [thread:$0]  (!%p1231_p11), %s1229_s9, 1024, %s1235_s28, %s1237_s10, %s1099_s25, %s1099_s25, %s1100_s11  }
  0x49   : > { %p1467_p0 = scmp.ne.s32.totalorder %s1462_s23, 0 }
  0x4a   : > { %s1268_s12 = sand.u32 (!%p1467_p0), 1, %s1085_s16   ;;  %p1468_p5 = scmp.ne.s32.totalorder (!%p1467_p0), %s1460_s21, 0 }
  0x4b   : > { %196 = sbr.rel (%p1467_p0) target bundleno = 401 (0x191), region = 36  ;;  %s754_s13 = sshll.u32 (!%p1467_p0), %s1268_s12, 6 }
  0x4c   : > { %s199_s14 = scalar_lea.sflag (!%p1467_p0), [#allocation3], %s1268_s12  ;;  %s1274_s20 = scalar_lea.vmem (!%p1467_p0), [#allocation2], %s754_s13 }
  0x52   : > { %1068 = dma.done.wait (%p1468_p5), %s199_s14, 1024  }
  0x53   : > { %1070 = vsyncadd (%p1468_p5), %s199_s14, 4294966272  ;;  %p1469_p11 = scmp.eq.s32.totalorder %s1150_s19, 0 }
  0x55   : > { %1072 = dma.done.wait (%p1469_p11), [#allocation6], 1024   ;;  %p1470_p1 = pmov %p1469_p11 }
  0x56   : > { %v941_v0 = vld [vmem:[#allocation5] sm:$0xff]   ;;  %v942_v1 = vld [vmem:[#allocation5 + $0x8] sm:$0xff]   ;;  %v943_v2 = vld [vmem:[#allocation5 + $0x10] sm:$0xff]   ;;  %s1384_s29 = scalar_lea.vmem [#allocation7], %s754_s13  ;;  %s773_s10 = sshll.u32 %s1150_s19, 10 }
  0x57   : > { %1074 = vsyncadd (%p1470_p1), [#allocation6], 4294966272  ;;  %798 = vmatprep.subr.bf16.mxu0 %v941_v0  ;;  %846 = vmatprep.subr.bf16.mxu1 %v941_v0  ;;  %v944_v3 = vld [vmem:[#allocation5 + $0x18] sm:$0xff]   ;;  %v1285_v4 = vld [vmem:[%s1274_s20] sm:$0xff]  ;;  %s663_s6 = sshll.u32 %s1384_s29, 4  ;;  %s1404_s26 = scalar_lea.hbm %s1456_s4, %s773_s10  ;;  %s1406_s6 = int_to_ptr.vmem [resolvable:$true] %s663_s6 }
  0x58   : > { %799 = vmatpush3.bf16.msra.mxu0 %v941_v0  ;;  %854 = vmatpush3.bf16.msra.mxu1 %v941_v0  ;;  %v1288_v5 = vld [vmem:[%s1274_s20 + $0x8] sm:$0xff]  ;;  %v258_v7 = vmul.f32 %v1285_v4, %v1285_v4  ;;  %v945_v10 = vld [vmem:[#allocation5 + $0x20] sm:$0xff]   ;;  %v947_v12 = vld [vmem:[#allocation5 + $0x30] sm:$0xff]   ;;  %s650_s19 = scalar_lea.sflag [#allocation4], %s1268_s12  ;;  %s1023_s8 = scalar_lea.vmem %s1406_s6, 1024 }
  0x59   : > { %800 = vmatprep.subr.bf16.mxu0 %v942_v1  ;;  %847 = vmatprep.subr.bf16.mxu1 %v942_v1  ;;  %v266_v6 = vpack.c.bf16 %v1288_v5, %v1285_v4  ;;  %v259_v8 = vmul.f32 %v1288_v5, %v1288_v5  ;;  %v946_v11 = vld [vmem:[#allocation5 + $0x28] sm:$0xff]   ;;  %v1297_v13 = vld [vmem:[%s1274_s20 + $0x10] sm:$0xff]  ;;  %v1300_v14 = vld [vmem:[%s1274_s20 + $0x18] sm:$0xff]  ;;  %p1024_p4 = scmp.ne.s32.totalorder %s1406_s6, %s1023_s8  ;;  %s1101_s25 = smov [#allocation7]  }
  0x5a   : > { %v948_v15 = vld [vmem:[#allocation5 + $0x38] sm:$0xff]   ;;  %v1303_v16 = vld [vmem:[%s1274_s20 + $0x20] sm:$0xff]  ;;  %v1306_v17 = vld [vmem:[%s1274_s20 + $0x28] sm:$0xff]  ;;  %v260_v18 = vmul.f32 %v1297_v13, %v1297_v13  ;;  %v261_v19 = vmul.f32 %v1300_v14, %v1300_v14  ;;  %v267_v22 = vpack.c.bf16 %v1300_v14, %v1297_v13  ;;  %s1027_s11 = sshll.u32 %s1101_s25, 4  ;;  %s1028_s11 = int_to_ptr.vmem [resolvable:$false] %s1027_s11 }
  0x5b   : > { %v290_v9 = vpack.c.bf16 %v259_v8, %v258_v7  ;;  %814 = vmatprep.mubr.bf16.mxu0 %v266_v6  ;;  %v262_v20 = vmul.f32 %v1303_v16, %v1303_v16  ;;  %v263_v21 = vmul.f32 %v1306_v17, %v1306_v17  ;;  %v1319_v24 = vld [vmem:[%s1274_s20 + $0x30] sm:$0xff]  ;;  %v1322_v25 = vld [vmem:[%s1274_s20 + $0x38] sm:$0xff]  ;;  %v270_v26 = vunpack.c.l.bf16 %v266_v6  ;;  %p1025_p6 = pnand %p1024_p4, %p1220_p12  ;;  %s1029_s13 = scalar_lea.vmem %s1028_s11, 2048 }
  0x5c   : > { %801 = vmatpush3.bf16.msra.mxu0 %v942_v1  ;;  %855 = vmatpush3.bf16.msra.mxu1 %v942_v1  ;;  %v291_v23 = vpack.c.bf16 %v261_v19, %v260_v18  ;;  %v271_v27 = vunpack.c.h.bf16 %v266_v6  ;;  %v268_v28 = vpack.c.bf16 %v1306_v17, %v1303_v16  ;;  %v264_v32 = vmul.f32 %v1319_v24, %v1319_v24  ;;  %p1030_p10 = scmp.lt.s32.totalorder %s1406_s6, %s1028_s11  ;;  %p1031_p13 = scmp.lt.s32.totalorder %s1029_s13, %s1023_s8 }
  0x5d   : > { %802 = vmatprep.subr.bf16.mxu0 %v943_v2  ;;  %848 = vmatprep.subr.bf16.mxu1 %v943_v2  ;;  %v292_v29 = vpack.c.bf16 %v263_v21, %v262_v20  ;;  %v294_v30 = vunpack.c.l.bf16 %v290_v9  ;;  %v295_v31 = vunpack.c.h.bf16 %v290_v9  ;;  %v265_v33 = vmul.f32 %v1322_v25, %v1322_v25  ;;  %p1026_p8 = pneg %p1025_p6 }
  0x5e   : > { %830 = vmatprep.mubr.bf16.mxu1 %v290_v9  ;;  %v278_v34 = vsub.f32 %v1285_v4, %v270_v26  ;;  %v279_v35 = vsub.f32 %v1288_v5, %v271_v27  ;;  %v269_v38 = vpack.c.bf16 %v1322_v25, %v1319_v24  ;;  %v272_v40 = vunpack.c.l.bf16 %v267_v22  ;;  %p1032_p3 = por %p1031_p13, %p1030_p10 }
  0x5f   : > { %v302_v36 = vsub.f32 %v258_v7, %v294_v30  ;;  %v303_v37 = vsub.f32 %v259_v8, %v295_v31  ;;  %v293_v39 = vpack.c.bf16 %v265_v33, %v264_v32  ;;  %v273_v41 = vunpack.c.h.bf16 %v267_v22 }
  0x60   : > { %803 = vmatpush3.bf16.msra.mxu0 %v943_v2  ;;  %856 = vmatpush3.bf16.msra.mxu1 %v943_v2  ;;  %v286_v42 = vpack.c.bf16 %v279_v35, %v278_v34  ;;  %v296_v43 = vunpack.c.l.bf16 %v291_v23  ;;  %v297_v44 = vunpack.c.h.bf16 %v291_v23  ;;  %v274_v45 = vunpack.c.l.bf16 %v268_v28  ;;  %p1033_p7 = pnand %p1032_p3, %p1026_p8 }
  0x61   : > { %804 = vmatprep.subr.bf16.mxu0 %v944_v3  ;;  %849 = vmatprep.subr.bf16.mxu1 %v944_v3  ;;  %v310_v46 = vpack.c.bf16 %v303_v37, %v302_v36  ;;  %v275_v47 = vunpack.c.h.bf16 %v268_v28  ;;  %v298_v48 = vunpack.c.l.bf16 %v292_v29  ;;  %v299_v49 = vunpack.c.h.bf16 %v292_v29 }
  0x62   : > { %v280_v50 = vsub.f32 %v1297_v13, %v272_v40  ;;  %v281_v51 = vsub.f32 %v1300_v14, %v273_v41  ;;  %v304_v52 = vsub.f32 %v260_v18, %v296_v43  ;;  %v305_v53 = vsub.f32 %v261_v19, %v297_v44 }
  0x63   : > { %v282_v54 = vsub.f32 %v1303_v16, %v274_v45  ;;  %v283_v55 = vsub.f32 %v1306_v17, %v275_v47  ;;  %v306_v56 = vsub.f32 %v262_v20, %v298_v48  ;;  %v307_v57 = vsub.f32 %v263_v21, %v299_v49 }
  0x64   : > { %805 = vmatpush3.bf16.msra.mxu0 %v944_v3  ;;  %857 = vmatpush3.bf16.msra.mxu1 %v944_v3  ;;  %v287_v58 = vpack.c.bf16 %v281_v51, %v280_v50  ;;  %v276_v59 = vunpack.c.l.bf16 %v269_v38  ;;  %v311_v60 = vpack.c.bf16 %v305_v53, %v304_v52  ;;  %v277_v61 = vunpack.c.h.bf16 %v269_v38 }
  0x65   : > { %806 = vmatprep.subr.bf16.mxu0 %v945_v10  ;;  %850 = vmatprep.subr.bf16.mxu1 %v945_v10  ;;  %v300_v62 = vunpack.c.l.bf16 %v293_v39  ;;  %v301_v63 = vunpack.c.h.bf16 %v293_v39  ;;  %v288_v0 = vpack.c.bf16 %v283_v55, %v282_v54  ;;  %v312_v1 = vpack.c.bf16 %v307_v57, %v306_v56 }
  0x66   : > { %v284_v2 = vsub.f32 %v1319_v24, %v276_v59  ;;  %v285_v3 = vsub.f32 %v1322_v25, %v277_v61 }
  0x67   : > { %v308_v6 = vsub.f32 %v264_v32, %v300_v62  ;;  %v309_v7 = vsub.f32 %v265_v33, %v301_v63 }
  0x68   : > { %807 = vmatpush3.bf16.msra.mxu0 %v945_v10  ;;  %858 = vmatpush3.bf16.msra.mxu1 %v945_v10  ;;  %v289_v8 = vpack.c.bf16 %v285_v3, %v284_v2 }
  0x69   : > { %808 = vmatprep.subr.bf16.mxu0 %v946_v11  ;;  %851 = vmatprep.subr.bf16.mxu1 %v946_v11  ;;  %v313_v9 = vpack.c.bf16 %v309_v7, %v308_v6 }
  0x6c   : > { %809 = vmatpush3.bf16.msra.mxu0 %v946_v11  ;;  %859 = vmatpush3.bf16.msra.mxu1 %v946_v11 }
  0x6d   : > { %810 = vmatprep.subr.bf16.mxu0 %v947_v12  ;;  %852 = vmatprep.subr.bf16.mxu1 %v947_v12 }
  0x70   : > { %811 = vmatpush3.bf16.msra.mxu0 %v947_v12  ;;  %860 = vmatpush3.bf16.msra.mxu1 %v947_v12 }
  0x71   : > { %812 = vmatprep.subr.bf16.mxu0 %v948_v15  ;;  %853 = vmatprep.subr.bf16.mxu1 %v948_v15 }
  0x74   : > { %813 = vmatpush3.bf16.msra.mxu0 %v948_v15  ;;  %861 = vmatpush3.bf16.msra.mxu1 %v948_v15 }
  0x77   : > { %815 = vmatmul.mubr.bf16.vlgmr.msra.gmra.mrb[0].mxu0 %v267_v22  ;;  %831 = vmatmul.mubr.bf16.vlgmr.msra.gmra.mrb[0].mxu1 %v291_v23 }
  0x78   : > { %818 = vmatprep.mubr.bf16.mxu0 %v268_v28  ;;  %834 = vmatprep.mubr.bf16.mxu1 %v292_v29 }
  0x7f   : > { %819 = vmatmul.mubr.bf16.gmra.mrb[4].mxu0 %v269_v38  ;;  %835 = vmatmul.mubr.bf16.gmra.mrb[4].mxu1 %v293_v39 }
  0x80   : > { %822 = vmatprep.mubr.bf16.mxu0 %v286_v42  ;;  %838 = vmatprep.mubr.bf16.mxu1 %v310_v46 }
  0x87   : > { %823 = vmatmul.mubr.bf16.gmra.mrb[0].mxu0 %v287_v58  ;;  %839 = vmatmul.mubr.bf16.gmra.mrb[0].mxu1 %v311_v60 }
  0x88   : > { %826 = vmatprep.mubr.bf16.mxu0 %v288_v0  ;;  %842 = vmatprep.mubr.bf16.mxu1 %v312_v1 }
  0x8f   : > { %827 = vmatmul.mubr.bf16.gmra.mrb[4].mxu0 %v289_v8  ;;  %843 = vmatmul.mubr.bf16.gmra.mrb[4].mxu1 %v313_v9 }
 0x15a   : > { %v824_v10 = vpop.f32.mrb[0].mxu0  ;;  %v840_v11 = vpop.f32.mrb[0].mxu1 }
 0x15b   : > { %v1340_v12 = vmul.f32 0.03125, %v824_v10  ;;  %v428_v15 = vpop.f32.mrb[1].mxu0  ;;  %v492_v18 = vpop.f32.mrb[1].mxu1  ;;  %v549_v23 = vmul.f32 0.03125, %v840_v11 }
 0x15c   : > { %v1342_v19 = vmul.f32 0.03125, %v428_v15  ;;  %v825_v20 = vpop.f32.mrb[2].mxu0  ;;  %v841_v21 = vpop.f32.mrb[2].mxu1  ;;  %v547_v30 = vmul.f32 0.03125, %v492_v18 }
 0x15d   : > { %v557_v22 = vmul.f32 %v1340_v12, %v1340_v12  ;;  %v1346_v26 = vmul.f32 0.03125, %v825_v20  ;;  %v431_v27 = vpop.f32.mrb[3].mxu0  ;;  %v495_v28 = vpop.f32.mrb[3].mxu1  ;;  %v550_v34 = vmul.f32 0.03125, %v841_v21  ;;  %v599_v21 = vsub.f32 %v1297_v13, %v1340_v12  ;;  %v766_v13 = vld [vmem:[%s1454_s2] ss:$0 sm:$0xff] }
 0x15e   : > { %v555_v29 = vmul.f32 %v1342_v19, %v1342_v19  ;;  %v1350_v31 = vmul.f32 0.03125, %v431_v27  ;;  %v548_v37 = vmul.f32 0.03125, %v495_v28  ;;  %v765_v27 = vld [vmem:[%s1453_s1] ss:$0 sm:$0xff]  ;;  %v597_v28 = vsub.f32 %v1285_v4, %v1342_v19 }
 0x15f   : > { %v565_v32 = vsub.f32 %v549_v23, %v557_v22  ;;  %v558_v33 = vmul.f32 %v1346_v26, %v1346_v26 }
 0x160   : > { %v563_v35 = vsub.f32 %v547_v30, %v555_v29  ;;  %v556_v36 = vmul.f32 %v1350_v31, %v1350_v31 }
 0x161   : > { %v573_v38 = vmax.f32 %v565_v32, 0.0  ;;  %v566_v39 = vsub.f32 %v550_v34, %v558_v33  ;;  %v600_v33 = vsub.f32 %v1300_v14, %v1346_v26 }
 0x162   : > { %v571_v40 = vmax.f32 %v563_v35, 0.0  ;;  %v564_v41 = vsub.f32 %v548_v37, %v556_v36  ;;  %v828_v42 = vpop.f32.mrb[4].mxu0  ;;  %v844_v43 = vpop.f32.mrb[4].mxu1  ;;  %v598_v36 = vsub.f32 %v1288_v5, %v1350_v31 }
 0x163   : > { %v581_v44 = vadd.f32 1e-06, %v573_v38  ;;  %v574_v45 = vmax.f32 %v566_v39, 0.0  ;;  %v1356_v46 = vmul.f32 0.03125, %v828_v42  ;;  %v444_v47 = vpop.f32.mrb[5].mxu0  ;;  %v508_v51 = vpop.f32.mrb[5].mxu1 }
 0x164   : > { %v579_v48 = vadd.f32 1e-06, %v571_v40  ;;  %v572_v49 = vmax.f32 %v564_v41, 0.0  ;;  %v1358_v50 = vmul.f32 0.03125, %v444_v47  ;;  %v829_v52 = vpop.f32.mrb[6].mxu0  ;;  %v553_v55 = vmul.f32 0.03125, %v844_v43 }
 0x165   : > { %949 = vrsqrt.f32 %v581_v44  ;;  %v582_v53 = vadd.f32 1e-06, %v574_v45  ;;  %v561_v54 = vmul.f32 %v1356_v46, %v1356_v46  ;;  %v845_v56 = vpop.f32.mrb[6].mxu1  ;;  %v447_v57 = vpop.f32.mrb[7].mxu0  ;;  %v551_v62 = vmul.f32 0.03125, %v508_v51 }
 0x166   : > { %951 = vrsqrt.f32 %v579_v48  ;;  %v580_v58 = vadd.f32 1e-06, %v572_v49  ;;  %v559_v59 = vmul.f32 %v1358_v50, %v1358_v50  ;;  %v511_v60 = vpop.f32.mrb[7].mxu1  ;;  %v1364_v63 = vmul.f32 0.03125, %v829_v52 }
 0x167   : > { %953 = vrsqrt.f32 %v582_v53  ;;  %v569_v61 = vsub.f32 %v553_v55, %v561_v54  ;;  %v544_v0 = vmul.f32 0.03125, %v447_v57  ;;  %v554_v6 = vmul.f32 0.03125, %v845_v56 }
 0x168   : > { %955 = vrsqrt.f32 %v580_v58  ;;  %v567_v2 = vsub.f32 %v551_v62, %v559_v59  ;;  %v562_v3 = vmul.f32 %v1364_v63, %v1364_v63  ;;  %v552_v8 = vmul.f32 0.03125, %v511_v60 }
 0x169   : > { %v577_v1 = vmax.f32 %v569_v61, 0.0  ;;  %v560_v7 = vmul.f32 %v544_v0, %v544_v0  ;;  %v603_v31 = vsub.f32 %v1319_v24, %v1356_v46  ;;  %v601_v45 = vsub.f32 %v1303_v16, %v1358_v50 }
 0x16a   : > { %v575_v10 = vmax.f32 %v567_v2, 0.0  ;;  %v570_v11 = vsub.f32 %v554_v6, %v562_v3  ;;  %v604_v51 = vsub.f32 %v1322_v25, %v1364_v63  ;;  %v602_v46 = vsub.f32 %v1306_v17, %v544_v0 }
 0x16b   : > { %v585_v9 = vadd.f32 1e-06, %v577_v1  ;;  %v568_v15 = vsub.f32 %v552_v8, %v560_v7 }
 0x16c   : > { %v583_v18 = vadd.f32 1e-06, %v575_v10  ;;  %v578_v20 = vmax.f32 %v570_v11, 0.0 }
 0x16d   : > { %957 = vrsqrt.f32 %v585_v9  ;;  %v576_v22 = vmax.f32 %v568_v15, 0.0 }
 0x16e   : > { %959 = vrsqrt.f32 %v583_v18  ;;  %v586_v29 = vadd.f32 1e-06, %v578_v20 }
 0x16f   : > { %v950_v23 = vpop.eup %949  ;;  %v584_v34 = vadd.f32 1e-06, %v576_v22 }
 0x170   : > { %v952_v30 = vpop.eup %951  ;;  %v607_v32 = vmul.f32 %v950_v23, %v599_v21  ;;  %961 = vrsqrt.f32 %v586_v29 }
 0x171   : > { %v954_v35 = vpop.eup %953  ;;  %v605_v12 = vmul.f32 %v952_v30, %v597_v28  ;;  %963 = vrsqrt.f32 %v584_v34 }
 0x172   : > { %v956_v4 = vpop.eup %955  ;;  %v621_v19 = vmul.f32 %v765_v27, %v607_v32  ;;  %v608_v37 = vmul.f32 %v954_v35, %v600_v33 }
 0x173   : > { %v619_v38 = vmul.f32 %v765_v27, %v605_v12  ;;  %v606_v39 = vmul.f32 %v956_v4, %v598_v36 }
 0x174   : > { %v635_v40 = vadd.f32 %v766_v13, %v621_v19  ;;  %v622_v14 = vmul.f32 %v765_v27, %v608_v37 }
 0x175   : > { %v633_v26 = vadd.f32 %v766_v13, %v619_v38  ;;  %v620_v41 = vmul.f32 %v765_v27, %v606_v39 }
 0x176   : > { %643 = vst [vmem:[%s1384_s29 + $0x10] sm:$0xff] %v635_v40  ;;  %v636_v5 = vadd.f32 %v766_v13, %v622_v14 }
 0x177   : > { %v958_v42 = vpop.eup %957  ;;  %641 = vst [vmem:[%s1384_s29] sm:$0xff] %v633_v26  ;;  %v634_v43 = vadd.f32 %v766_v13, %v620_v41 }
 0x178   : > { %644 = vst [vmem:[%s1384_s29 + $0x18] sm:$0xff] %v636_v5  ;;  %v611_v44 = vmul.f32 %v958_v42, %v603_v31  ;;  %v960_v47 = vpop.eup %959 }
 0x179   : > { %642 = vst [vmem:[%s1384_s29 + $0x8] sm:$0xff] %v634_v43  ;;  %v609_v49 = vmul.f32 %v960_v47, %v601_v45 }
 0x17a   : > { %v625_v48 = vmul.f32 %v765_v27, %v611_v44  ;;  %v962_v24 = vpop.eup %961 }
 0x17b   : > { %v964_v52 = vpop.eup %963  ;;  %v623_v54 = vmul.f32 %v765_v27, %v609_v49  ;;  %v612_v55 = vmul.f32 %v962_v24, %v604_v51 }
 0x17c   : > { %v639_v53 = vadd.f32 %v766_v13, %v625_v48  ;;  %v610_v56 = vmul.f32 %v964_v52, %v602_v46 }
 0x17d   : > { %v637_v16 = vadd.f32 %v766_v13, %v623_v54  ;;  %v626_v50 = vmul.f32 %v765_v27, %v612_v55 }
 0x17e   : > { %647 = vst [vmem:[%s1384_s29 + $0x30] sm:$0xff] %v639_v53  ;;  %v624_v57 = vmul.f32 %v765_v27, %v610_v56 }
 0x17f   : > { %645 = vst [vmem:[%s1384_s29 + $0x20] sm:$0xff] %v637_v16  ;;  %v640_v25 = vadd.f32 %v766_v13, %v626_v50 }
 0x180   : > { %v638_v17 = vadd.f32 %v766_v13, %v624_v57 }
 0x181   : > { %648 = vst [vmem:[%s1384_s29 + $0x38] sm:$0xff] %v640_v25 }
 0x182   : > { %646 = vst [vmem:[%s1384_s29 + $0x28] sm:$0xff] %v638_v17 }
 0x183   : > { %1036 = shalt.err (!%p1033_p7)
}
 0x184   : > { %s1037_s14 = scalar_lea.hbm %s1404_s26, 1024  ;;  %s1041_s23 = scalar_lea.hbm %s1456_s4, 2048 }
 0x185   : > { %p1038_p9 = scmp.ne.s32.totalorder %s1404_s26, %s1037_s14  ;;  %p1042_p5 = scmp.lt.u32.totalorder %s1404_s26, %s1456_s4 }
 0x186   : > { %p1043_p11 = scmp.lt.u32.totalorder %s1041_s23, %s1037_s14  ;;  %p1045_p4 = scmp.lt.u32.totalorder %s1037_s14, %s1404_s26 }
 0x187   : > { %p1039_p2 = pnand %p1038_p9, %p1220_p12 }
 0x188   : > { %p1044_p1 = por %p1043_p11, %p1042_p5 }
 0x189   : > { %p1040_p0 = pneg %p1039_p2 }
 0x18a   : > { %p1046_p6 = por %p1045_p4, %p1044_p1 }
 0x18c   : > { %p1047_p8 = pnand %p1046_p6, %p1040_p0 }
 0x18e   : > { %1050 = shalt.err (!%p1047_p8)
}
 0x18f   : > { %s1102_s29 = smov 128   ;;  %s1103_s10 = smov 8  }
 0x190   : > { %884 = dma.vmem_to_hbm [thread:$0]  (%p1220_p12), %s1406_s6, 1024, %s1404_s26, %s650_s19, %s1102_s29, %s1102_s29, %s1103_s10  }
 0x191 PF: > { %s678_s5 = sand.u32 1, %s1081_s15   ;;  %p1471_p10 = scmp.ne.s32.totalorder %s1461_s22, 0 }
 0x192   : > { %p1472_p13 = scmp.ge.s32.totalorder %s1093_s18, 2  ;;  %s679_s7 = scalar_lea.sflag [#allocation4], %s678_s5 }
 0x194   : > { %p895_p3 = pnand %p1472_p13, %p1471_p10 }
 0x196   : > { %1076 = dma.done.wait (!%p895_p3), %s679_s7, 1024  }
 0x197   : > { %1078 = vsyncadd (!%p895_p3), %s679_s7, 4294966272  ;;  %p18_p7 = scmp.ge.s32.totalorder %s1185_s27, 4   ;;  %s1473_s15 = smov %s1085_s16 }
 0x198   : > { %s1474_s16 = smov %s1089_s17  ;;  %s1475_s17 = smov %s1216_s24 }
 0x199   : > { %s1476_s18 = smov %s1185_s27  ;;  %20 = sbr.rel (!%p18_p7) target bundleno = 6 (0x6), region = 85 }
 0x1a0   :  { %684 = vsyncpa [#allocation3], 1 }
 0x1a1   :  { %686 = vsyncpa [#allocation3 + $0x1], 1 }
 0x1a2   :  { %687 = vsyncpa [#allocation6], 1 }
 0x1a3   :  { %688 = vsyncpa [#allocation4], 1 }
 0x1a4   :  { %690 = vsyncpa [#allocation4 + $0x1], 1 }

</bundles_post_ra>
